<compile_context>
chip_gen: v6e
topology: v6e:2x2x1
jax: 0.10.0
libtpu: 0.0.40
codegen_flags: <defaults>
</compile_context>

<pallas_src>
import functools
import math

import numpy as np

import jax
import jax.numpy as jnp
from jax import lax
from jax.experimental import pallas as pl
from jax.experimental.pallas import tpu as pltpu

SQRT2 = math.sqrt(2.0)


def _fused_kernel(x_ref, wpw_ref, wdw_ref, mask_ref, o_ref, *,
                  HW, W, kh, kw, ph, pw, neg_slope):
    """Processes a block of BT batch images per grid step.

    x_ref    : (BT, C_in,  HW)     bf16 input activations (flattened spatial on lanes)
    wpw_ref  : (BT, C_out, C_in)   bf16 1x1-conv weight with mstyle1 folded in
    wdw_ref  : (BT, C_out, kh*kw)  bf16 depthwise weights with mstyle2 folded in
    mask_ref : (kh*kw, HW)         f32 spatial validity masks (grid-resident block)
    o_ref    : (BT, C_out, HW)     f32 output activations
    """
    BT, C_out, _ = o_ref.shape
    x = x_ref[...]
    wpw = wpw_ref[...]

    # --- 1x1 conv (mstyle1 folded into wpw); bf16 operands, f32 accumulate on MXU ---
    y = jnp.einsum("boc,bcs->bos", wpw, x, preferred_element_type=jnp.float32)

    # --- ScaledLeakyReLU: leaky_relu(y, 0.2) * sqrt(2), kept in f32 ---
    y = jnp.where(y >= 0.0, y, neg_slope * y) * SQRT2

    # Merge (BT, C_out) into the sublane dim; lane dim (HW) untouched -> layout-preserving.
    y2 = y.reshape(BT * C_out, HW)
    wdw2 = wdw_ref[...].astype(jnp.float32).reshape(BT * C_out, kh * kw)
    mask = mask_ref[...]                                    # (kh*kw, HW) f32

    # --- depthwise kh x kw "same" conv, taps kept in registers ---
    center = ph * kw + pw
    acc = y2 * wdw2[:, center][:, None]                     # center tap: no roll, no mask

    for i in range(kh):
        for j in range(kw):
            t = i * kw + j
            if t == center:
                continue
            d = (i - ph) * W + (j - pw)                     # flattened source offset
            # shifted[p] = y2[(p + d) % HW]; wrap-around values land exactly on
            # out-of-image positions, which the precomputed mask zeroes.
            shifted = pltpu.roll(y2, (-d) % HW, 1)
            acc = acc + (shifted * wdw2[:, t][:, None]) * mask[t]

    o_ref[...] = acc.reshape(BT, C_out, HW).astype(o_ref.dtype)


def _pick_batch_block(B):
    """Images per grid step: amortize per-step overhead but keep >=2 parallel steps."""
    if B < 4:
        return 1
    for bt in range(min(B // 2, 8), 0, -1):
        if B % bt == 0:
            return bt
    return 1


def wn_conv2d_small_t(x, style, mod1_w, mod1_b, mod2_w, mod2_b, w_pw, w_dw,
                      *, negative_slope=0.2):
    """Forward pass of WNConv2d_small_t.

    x: (B, C_in, H, W) NCHW f32, style: (B, style_dim).
    mod1_w/mod1_b: modulation1 Linear (C_in, style_dim) / (C_in,)
    mod2_w/mod2_b: modulation2 Linear (C_out, style_dim) / (C_out,)
    w_pw: (C_out, C_in, 1, 1) pointwise conv weight (no bias)
    w_dw: (C_out, 1, kh, kw)  depthwise conv weight (no bias)
    """
    B, C_in, H, W = x.shape
    C_out = w_pw.shape[0]
    kh, kw = w_dw.shape[2], w_dw.shape[3]
    ph, pw = kh // 2, kw // 2
    HW = H * W

    scale1 = 1.0 / math.sqrt(C_in)
    scale2 = 1.0 / math.sqrt(C_out * kh * kw)

    # --- tiny glue: style modulation linears (O(B*C) work, stays in XLA) ---
    mstyle1 = (style @ mod1_w.T + mod1_b) * scale1                      # (B, C_in)
    mstyle2 = (style @ mod2_w.T + mod2_b) * scale2                      # (B, C_out)

    # --- fold modulations into tiny per-batch weights (convs are linear) ---
    # convpw(mstyle1 * x) == (w_pw * mstyle1) applied to x
    # convdw(mstyle2 * y) == (w_dw * mstyle2) applied to y (depthwise = per-channel)
    wpw_mod = (w_pw.reshape(C_out, C_in)[None] * mstyle1[:, None, :]).astype(jnp.bfloat16)
    wdw_mod = (w_dw.reshape(C_out, kh * kw)[None] * mstyle2[:, :, None]).astype(jnp.bfloat16)

    # lane-dense streaming layout; bf16 halves HBM bytes of the only big tensor
    x3 = x.reshape(B, C_in, HW).astype(jnp.bfloat16)

    # --- precomputed spatial validity masks, one (HW,) row per tap (grid-resident) ---
    hh = np.arange(H)[:, None]
    ww = np.arange(W)[None, :]
    mask_np = np.zeros((kh * kw, HW), np.float32)
    for i in range(kh):
        for j in range(kw):
            valid = ((hh + (i - ph) >= 0) & (hh + (i - ph) < H) &
                     (ww + (j - pw) >= 0) & (ww + (j - pw) < W))
            mask_np[i * kw + j] = valid.astype(np.float32).reshape(HW)
    masks = jnp.asarray(mask_np)

    BT = _pick_batch_block(B)
    grid = (B // BT,)

    kernel = functools.partial(_fused_kernel, HW=HW, W=W, kh=kh, kw=kw,
                               ph=ph, pw=pw, neg_slope=negative_slope)

    flops = 2 * B * HW * C_out * (C_in + kh * kw)
    bytes_accessed = (2 * B * C_in * HW + 4 * B * C_out * HW
                      + 2 * B * C_out * (C_in + kh * kw) + 4 * kh * kw * HW)

    out = pl.pallas_call(
        kernel,
        out_shape=jax.ShapeDtypeStruct((B, C_out, HW), jnp.float32),
        grid_spec=pltpu.PrefetchScalarGridSpec(
            num_scalar_prefetch=0,
            grid=grid,
            in_specs=[
                pl.BlockSpec((BT, C_in, HW), lambda b: (b, 0, 0)),        # x (streamed once)
                pl.BlockSpec((BT, C_out, C_in), lambda b: (b, 0, 0)),     # modulated pw weight
                pl.BlockSpec((BT, C_out, kh * kw), lambda b: (b, 0, 0)),  # modulated dw weight
                pl.BlockSpec((kh * kw, HW), lambda b: (0, 0)),            # tap masks (resident)
            ],
            out_specs=pl.BlockSpec((BT, C_out, HW), lambda b: (b, 0, 0)),
        ),
        compiler_params=pltpu.CompilerParams(
            dimension_semantics=("parallel",),
            vmem_limit_bytes=32 * 1024 * 1024,   # explicit; well under physical VMEM on v5e/v6e/v7x
        ),
        cost_estimate=pl.CostEstimate(flops=flops, transcendentals=0,
                                      bytes_accessed=bytes_accessed),
    )(x3, wpw_mod, wdw_mod, masks)

    return out.reshape(B, C_out, H, W)


if __name__ == "__main__":
    B, C_in, C_out, H, W = 2, 4, 8, 16, 16
    style_dim, ksize = 8, 3

    key = jax.random.PRNGKey(0)
    k1, k2, k3, k4, k5, k6 = jax.random.split(key, 6)

    x = jax.random.normal(k1, (B, C_in, H, W), jnp.float32)
    style = jax.random.normal(k2, (B, style_dim), jnp.float32)

    # parameters matching the PyTorch __init__ (kaiming-style fan_in init, biases = 1)
    mod1_w = jax.random.normal(k3, (C_in, style_dim), jnp.float32) * math.sqrt(2.0 / style_dim)
    mod1_b = jnp.ones((C_in,), jnp.float32)
    mod2_w = jax.random.normal(k4, (C_out, style_dim), jnp.float32) * math.sqrt(2.0 / style_dim)
    mod2_b = jnp.ones((C_out,), jnp.float32)
    w_pw = jax.random.normal(k5, (C_out, C_in, 1, 1), jnp.float32) * math.sqrt(2.0 / C_in)
    w_dw = jax.random.normal(k6, (C_out, 1, ksize, ksize), jnp.float32) * math.sqrt(2.0 / (ksize * ksize))

    out = wn_conv2d_small_t(x, style, mod1_w, mod1_b, mod2_w, mod2_b, w_pw, w_dw)
    out = jax.block_until_ready(out)

    # --- plain-JAX f32 reference for a correctness check ---
    scale1 = 1.0 / math.sqrt(C_in)
    scale2 = 1.0 / math.sqrt(C_out * ksize * ksize)
    mstyle1 = (style @ mod1_w.T + mod1_b) * scale1
    xr = x * mstyle1[:, :, None, None]
    yr = lax.conv_general_dilated(xr, w_pw, (1, 1), ((0, 0), (0, 0)),
                                  dimension_numbers=("NCHW", "OIHW", "NCHW"))
    yr = jnp.where(yr >= 0, yr, 0.2 * yr) * math.sqrt(2.0)
    mstyle2 = (style @ mod2_w.T + mod2_b) * scale2
    yr = yr * mstyle2[:, :, None, None]
    ref = lax.conv_general_dilated(yr, w_dw, (1, 1),
                                   ((ksize // 2,) * 2, (ksize // 2,) * 2),
                                   dimension_numbers=("NCHW", "OIHW", "NCHW"),
                                   feature_group_count=C_out)

    assert out.shape == (B, C_out, H, W)
    max_err = float(jnp.max(jnp.abs(out - ref)))
    # kernel streams x / weights in bf16 (reference is f32) -> loosened tolerance
    assert jnp.allclose(out, ref, atol=2e-1, rtol=5e-2), max_err
    print("KERNEL_OK")
</pallas_src>

<mosaic_0001>
module attributes {stable_mosaic.version = 11 : i64} {
  func.func @_fused_kernel(%arg0: i32, %arg1: memref<1x4x256xbf16, #tpu.memory_space<vmem>>, %arg2: memref<1x8x4xbf16, #tpu.memory_space<vmem>>, %arg3: memref<1x8x9xbf16, #tpu.memory_space<vmem>>, %arg4: memref<9x256xf32, #tpu.memory_space<vmem>>, %arg5: memref<1x8x256xf32, #tpu.memory_space<vmem>>) attributes {dimension_semantics = [#tpu.dimension_semantics<parallel>], iteration_bounds = array<i64: 2>, scalar_prefetch = 0 : i64, scratch_operands = 0 : i64, tpu.core_type = #tpu.core_type<tc>, window_params = [{transform_indices = @transform_0, window_bounds = array<i64: 1, 4, 256>}, {transform_indices = @transform_1, window_bounds = array<i64: 1, 8, 4>}, {transform_indices = @transform_2, window_bounds = array<i64: 1, 8, 9>}, {pipeline_mode = #tpu.pipeline_mode<synchronous>, transform_indices = @transform_3, window_bounds = array<i64: 9, 256>}, {transform_indices = @transform_4, window_bounds = array<i64: 1, 8, 256>}]} {
    %c0 = arith.constant 0 : index
    %c0_0 = arith.constant 0 : index
    %c0_1 = arith.constant 0 : index
    %0 = vector.load %arg1[%c0, %c0_0, %c0_1] : memref<1x4x256xbf16, #tpu.memory_space<vmem>>, vector<1x4x256xbf16>
    %c0_2 = arith.constant 0 : index
    %c0_3 = arith.constant 0 : index
    %c0_4 = arith.constant 0 : index
    %1 = vector.load %arg2[%c0_2, %c0_3, %c0_4] : memref<1x8x4xbf16, #tpu.memory_space<vmem>>, vector<1x8x4xbf16>
    "tpu.trace_start"() <{level = 10 : i32, message = "boc,bcs->bos"}> : () -> ()
    %cst = arith.constant dense<0.000000e+00> : vector<1x8x256xf32>
    %2 = tpu.matmul %1, %0, %cst {dimension_numbers = #tpu.dot_dimension_numbers<[2], [1], [1], [2], [0, 0, 0, 1, 1, 2], [0], [0]>} : vector<1x8x4xbf16>, vector<1x4x256xbf16>, vector<1x8x256xf32> -> vector<1x8x256xf32>
    %cst_5 = arith.constant 0.000000e+00 : f32
    "tpu.trace_stop"() : () -> ()
    %3 = vector.broadcast %cst_5 : f32 to vector<1x8x256xf32>
    %4 = arith.cmpf oge, %2, %3 : vector<1x8x256xf32>
    %cst_6 = arith.constant 2.000000e-01 : f32
    %5 = vector.broadcast %cst_6 : f32 to vector<1x8x256xf32>
    %6 = arith.mulf %5, %2 : vector<1x8x256xf32>
    %7 = arith.select %4, %2, %6 : vector<1x8x256xi1>, vector<1x8x256xf32>
    %cst_7 = arith.constant 1.41421354 : f32
    %8 = vector.broadcast %cst_7 : f32 to vector<1x8x256xf32>
    %9 = arith.mulf %7, %8 : vector<1x8x256xf32>
    %10 = vector.shape_cast %9 : vector<1x8x256xf32> to vector<8x256xf32>
    %c0_8 = arith.constant 0 : index
    %c0_9 = arith.constant 0 : index
    %c0_10 = arith.constant 0 : index
    %11 = vector.load %arg3[%c0_8, %c0_9, %c0_10] : memref<1x8x9xbf16, #tpu.memory_space<vmem>>, vector<1x8x9xbf16>
    %12 = arith.extf %11 : vector<1x8x9xbf16> to vector<1x8x9xf32>
    %13 = vector.shape_cast %12 : vector<1x8x9xf32> to vector<8x9xf32>
    %c0_11 = arith.constant 0 : index
    %c0_12 = arith.constant 0 : index
    %14 = vector.load %arg4[%c0_11, %c0_12] : memref<9x256xf32, #tpu.memory_space<vmem>>, vector<9x256xf32>
    %15 = vector.extract_strided_slice %13 {offsets = [0, 4], sizes = [8, 1], strides = [1, 1]} : vector<8x9xf32> to vector<8x1xf32>
    %16 = vector.shape_cast %15 : vector<8x1xf32> to vector<8xf32>
    %17 = vector.shape_cast %16 : vector<8xf32> to vector<8x1xf32>
    %18 = vector.broadcast %17 : vector<8x1xf32> to vector<8x256xf32>
    %19 = arith.mulf %10, %18 : vector<8x256xf32>
    %c17_i32 = arith.constant 17 : i32
    %20 = tpu.dynamic_rotate %10 by %c17_i32 dim 1 : vector<8x256xf32>, i32 -> vector<8x256xf32>
    %21 = vector.extract_strided_slice %13 {offsets = [0, 0], sizes = [8, 1], strides = [1, 1]} : vector<8x9xf32> to vector<8x1xf32>
    %22 = vector.shape_cast %21 : vector<8x1xf32> to vector<8xf32>
    %23 = vector.shape_cast %22 : vector<8xf32> to vector<8x1xf32>
    %24 = vector.broadcast %23 : vector<8x1xf32> to vector<8x256xf32>
    %25 = arith.mulf %20, %24 : vector<8x256xf32>
    %26 = vector.extract_strided_slice %14 {offsets = [0, 0], sizes = [1, 256], strides = [1, 1]} : vector<9x256xf32> to vector<1x256xf32>
    %27 = vector.shape_cast %26 : vector<1x256xf32> to vector<256xf32>
    %28 = vector.shape_cast %27 : vector<256xf32> to vector<1x256xf32>
    %29 = vector.broadcast %28 : vector<1x256xf32> to vector<8x256xf32>
    %30 = arith.mulf %25, %29 : vector<8x256xf32>
    %31 = arith.addf %19, %30 : vector<8x256xf32>
    %c16_i32 = arith.constant 16 : i32
    %32 = tpu.dynamic_rotate %10 by %c16_i32 dim 1 : vector<8x256xf32>, i32 -> vector<8x256xf32>
    %33 = vector.extract_strided_slice %13 {offsets = [0, 1], sizes = [8, 1], strides = [1, 1]} : vector<8x9xf32> to vector<8x1xf32>
    %34 = vector.shape_cast %33 : vector<8x1xf32> to vector<8xf32>
    %35 = vector.shape_cast %34 : vector<8xf32> to vector<8x1xf32>
    %36 = vector.broadcast %35 : vector<8x1xf32> to vector<8x256xf32>
    %37 = arith.mulf %32, %36 : vector<8x256xf32>
    %38 = vector.extract_strided_slice %14 {offsets = [1, 0], sizes = [1, 256], strides = [1, 1]} : vector<9x256xf32> to vector<1x256xf32>
    %39 = vector.shape_cast %38 : vector<1x256xf32> to vector<256xf32>
    %40 = vector.shape_cast %39 : vector<256xf32> to vector<1x256xf32>
    %41 = vector.broadcast %40 : vector<1x256xf32> to vector<8x256xf32>
    %42 = arith.mulf %37, %41 : vector<8x256xf32>
    %43 = arith.addf %31, %42 : vector<8x256xf32>
    %c15_i32 = arith.constant 15 : i32
    %44 = tpu.dynamic_rotate %10 by %c15_i32 dim 1 : vector<8x256xf32>, i32 -> vector<8x256xf32>
    %45 = vector.extract_strided_slice %13 {offsets = [0, 2], sizes = [8, 1], strides = [1, 1]} : vector<8x9xf32> to vector<8x1xf32>
    %46 = vector.shape_cast %45 : vector<8x1xf32> to vector<8xf32>
    %47 = vector.shape_cast %46 : vector<8xf32> to vector<8x1xf32>
    %48 = vector.broadcast %47 : vector<8x1xf32> to vector<8x256xf32>
    %49 = arith.mulf %44, %48 : vector<8x256xf32>
    %50 = vector.extract_strided_slice %14 {offsets = [2, 0], sizes = [1, 256], strides = [1, 1]} : vector<9x256xf32> to vector<1x256xf32>
    %51 = vector.shape_cast %50 : vector<1x256xf32> to vector<256xf32>
    %52 = vector.shape_cast %51 : vector<256xf32> to vector<1x256xf32>
    %53 = vector.broadcast %52 : vector<1x256xf32> to vector<8x256xf32>
    %54 = arith.mulf %49, %53 : vector<8x256xf32>
    %55 = arith.addf %43, %54 : vector<8x256xf32>
    %c1_i32 = arith.constant 1 : i32
    %56 = tpu.dynamic_rotate %10 by %c1_i32 dim 1 : vector<8x256xf32>, i32 -> vector<8x256xf32>
    %57 = vector.extract_strided_slice %13 {offsets = [0, 3], sizes = [8, 1], strides = [1, 1]} : vector<8x9xf32> to vector<8x1xf32>
    %58 = vector.shape_cast %57 : vector<8x1xf32> to vector<8xf32>
    %59 = vector.shape_cast %58 : vector<8xf32> to vector<8x1xf32>
    %60 = vector.broadcast %59 : vector<8x1xf32> to vector<8x256xf32>
    %61 = arith.mulf %56, %60 : vector<8x256xf32>
    %62 = vector.extract_strided_slice %14 {offsets = [3, 0], sizes = [1, 256], strides = [1, 1]} : vector<9x256xf32> to vector<1x256xf32>
    %63 = vector.shape_cast %62 : vector<1x256xf32> to vector<256xf32>
    %64 = vector.shape_cast %63 : vector<256xf32> to vector<1x256xf32>
    %65 = vector.broadcast %64 : vector<1x256xf32> to vector<8x256xf32>
    %66 = arith.mulf %61, %65 : vector<8x256xf32>
    %67 = arith.addf %55, %66 : vector<8x256xf32>
    %c255_i32 = arith.constant 255 : i32
    %68 = tpu.dynamic_rotate %10 by %c255_i32 dim 1 : vector<8x256xf32>, i32 -> vector<8x256xf32>
    %69 = vector.extract_strided_slice %13 {offsets = [0, 5], sizes = [8, 1], strides = [1, 1]} : vector<8x9xf32> to vector<8x1xf32>
    %70 = vector.shape_cast %69 : vector<8x1xf32> to vector<8xf32>
    %71 = vector.shape_cast %70 : vector<8xf32> to vector<8x1xf32>
    %72 = vector.broadcast %71 : vector<8x1xf32> to vector<8x256xf32>
    %73 = arith.mulf %68, %72 : vector<8x256xf32>
    %74 = vector.extract_strided_slice %14 {offsets = [5, 0], sizes = [1, 256], strides = [1, 1]} : vector<9x256xf32> to vector<1x256xf32>
    %75 = vector.shape_cast %74 : vector<1x256xf32> to vector<256xf32>
    %76 = vector.shape_cast %75 : vector<256xf32> to vector<1x256xf32>
    %77 = vector.broadcast %76 : vector<1x256xf32> to vector<8x256xf32>
    %78 = arith.mulf %73, %77 : vector<8x256xf32>
    %79 = arith.addf %67, %78 : vector<8x256xf32>
    %c241_i32 = arith.constant 241 : i32
    %80 = tpu.dynamic_rotate %10 by %c241_i32 dim 1 : vector<8x256xf32>, i32 -> vector<8x256xf32>
    %81 = vector.extract_strided_slice %13 {offsets = [0, 6], sizes = [8, 1], strides = [1, 1]} : vector<8x9xf32> to vector<8x1xf32>
    %82 = vector.shape_cast %81 : vector<8x1xf32> to vector<8xf32>
    %83 = vector.shape_cast %82 : vector<8xf32> to vector<8x1xf32>
    %84 = vector.broadcast %83 : vector<8x1xf32> to vector<8x256xf32>
    %85 = arith.mulf %80, %84 : vector<8x256xf32>
    %86 = vector.extract_strided_slice %14 {offsets = [6, 0], sizes = [1, 256], strides = [1, 1]} : vector<9x256xf32> to vector<1x256xf32>
    %87 = vector.shape_cast %86 : vector<1x256xf32> to vector<256xf32>
    %88 = vector.shape_cast %87 : vector<256xf32> to vector<1x256xf32>
    %89 = vector.broadcast %88 : vector<1x256xf32> to vector<8x256xf32>
    %90 = arith.mulf %85, %89 : vector<8x256xf32>
    %91 = arith.addf %79, %90 : vector<8x256xf32>
    %c240_i32 = arith.constant 240 : i32
    %92 = tpu.dynamic_rotate %10 by %c240_i32 dim 1 : vector<8x256xf32>, i32 -> vector<8x256xf32>
    %93 = vector.extract_strided_slice %13 {offsets = [0, 7], sizes = [8, 1], strides = [1, 1]} : vector<8x9xf32> to vector<8x1xf32>
    %94 = vector.shape_cast %93 : vector<8x1xf32> to vector<8xf32>
    %95 = vector.shape_cast %94 : vector<8xf32> to vector<8x1xf32>
    %96 = vector.broadcast %95 : vector<8x1xf32> to vector<8x256xf32>
    %97 = arith.mulf %92, %96 : vector<8x256xf32>
    %98 = vector.extract_strided_slice %14 {offsets = [7, 0], sizes = [1, 256], strides = [1, 1]} : vector<9x256xf32> to vector<1x256xf32>
    %99 = vector.shape_cast %98 : vector<1x256xf32> to vector<256xf32>
    %100 = vector.shape_cast %99 : vector<256xf32> to vector<1x256xf32>
    %101 = vector.broadcast %100 : vector<1x256xf32> to vector<8x256xf32>
    %102 = arith.mulf %97, %101 : vector<8x256xf32>
    %103 = arith.addf %91, %102 : vector<8x256xf32>
    %c239_i32 = arith.constant 239 : i32
    %104 = tpu.dynamic_rotate %10 by %c239_i32 dim 1 : vector<8x256xf32>, i32 -> vector<8x256xf32>
    %105 = vector.extract_strided_slice %13 {offsets = [0, 8], sizes = [8, 1], strides = [1, 1]} : vector<8x9xf32> to vector<8x1xf32>
    %106 = vector.shape_cast %105 : vector<8x1xf32> to vector<8xf32>
    %107 = vector.shape_cast %106 : vector<8xf32> to vector<8x1xf32>
    %108 = vector.broadcast %107 : vector<8x1xf32> to vector<8x256xf32>
    %109 = arith.mulf %104, %108 : vector<8x256xf32>
    %110 = vector.extract_strided_slice %14 {offsets = [8, 0], sizes = [1, 256], strides = [1, 1]} : vector<9x256xf32> to vector<1x256xf32>
    %111 = vector.shape_cast %110 : vector<1x256xf32> to vector<256xf32>
    %112 = vector.shape_cast %111 : vector<256xf32> to vector<1x256xf32>
    %113 = vector.broadcast %112 : vector<1x256xf32> to vector<8x256xf32>
    %114 = arith.mulf %109, %113 : vector<8x256xf32>
    %115 = arith.addf %103, %114 : vector<8x256xf32>
    %116 = vector.shape_cast %115 : vector<8x256xf32> to vector<1x8x256xf32>
    %c0_13 = arith.constant 0 : index
    %c0_14 = arith.constant 0 : index
    %c0_15 = arith.constant 0 : index
    %117 = vector.load %arg5[%c0_13, %c0_14, %c0_15] : memref<1x8x256xf32, #tpu.memory_space<vmem>>, vector<1x8x256xf32>
    tpu.vector_store %arg5[%c0_13, %c0_14, %c0_15], %116 {strides = array<i32>} : memref<1x8x256xf32, #tpu.memory_space<vmem>>, vector<1x8x256xf32>,
    return
  }
  func.func @transform_0(%arg0: i32) -> (i32, i32, i32) {
    %c0_i32 = arith.constant 0 : i32
    %c0_i32_0 = arith.constant 0 : i32
    %c0_i32_1 = arith.constant 0 : i32
    return %arg0, %c0_i32, %c0_i32_0 : i32, i32, i32
  }
  func.func @transform_1(%arg0: i32) -> (i32, i32, i32) {
    %c0_i32 = arith.constant 0 : i32
    %c0_i32_0 = arith.constant 0 : i32
    %c0_i32_1 = arith.constant 0 : i32
    return %arg0, %c0_i32, %c0_i32_0 : i32, i32, i32
  }
  func.func @transform_2(%arg0: i32) -> (i32, i32, i32) {
    %c0_i32 = arith.constant 0 : i32
    %c0_i32_0 = arith.constant 0 : i32
    %c0_i32_1 = arith.constant 0 : i32
    return %arg0, %c0_i32, %c0_i32_0 : i32, i32, i32
  }
  func.func @transform_3(%arg0: i32) -> (i32, i32) {
    %c0_i32 = arith.constant 0 : i32
    %c0_i32_0 = arith.constant 0 : i32
    %c0_i32_1 = arith.constant 0 : i32
    return %c0_i32, %c0_i32_0 : i32, i32
  }
  func.func @transform_4(%arg0: i32) -> (i32, i32, i32) {
    %c0_i32 = arith.constant 0 : i32
    %c0_i32_0 = arith.constant 0 : i32
    %c0_i32_1 = arith.constant 0 : i32
    return %arg0, %c0_i32, %c0_i32_0 : i32, i32, i32
  }
}

</mosaic_0001>

<bundles_post_ra>
// kernel: tpu_custom_call.1
= control target key start
LH: loop header
LB: loop body
LE: loop exit
PB: predicated region body
PF: predicated region fallthrough
CT: control target
= control target key end

     0   :  { %9 = vsyncpa [#allocation3], 0  ;;  %s1180_s0 = inlined_call_operand.vmem [shape: bf16[2,4,256], index: 0, kind: input, shape index: {}]   ;;  %s1181_s1 = inlined_call_operand.vmem [shape: bf16[2,8,4], index: 1, kind: input, shape index: {}]   ;;  %s1182_s2 = inlined_call_operand.hbm [shape: bf16[2,8,9], index: 2, kind: input, shape index: {}]   ;;  %s1183_s3 = inlined_call_operand.hbm [shape: f32[9,256], index: 3, kind: input, shape index: {}]   ;;  %s1184_s4 = inlined_call_operand.hbm [shape: f32[2,8,256], index: 4, kind: output, shape index: {}]  }
   0x1   :  { %11 = vsyncpa [#allocation3 + $0x1], 0 }
   0x2   :  { %12 = vsyncpa [#allocation6], 0 }
   0x3   :  { %13 = vsyncpa [#allocation4], 0 }
   0x4   :  { %15 = vsyncpa [#allocation4 + $0x1], 0  ;;  %s954_s15 = smov 0   ;;  %s956_s16 = smov 0  }
   0x5   :  { %s958_s17 = smov 0   ;;  %s960_s18 = smov 0  }
   0x6 LB: > { %s975_s19 = sadd.s32 4294967295, %s905_s18   ;;  %s673_s20 = sadd.s32 4294967294, %s905_s18   ;;  %s905_s18 = sphi %s960_s18, %s1206_s18   ;;  %s901_s17 = sphi %s958_s17, %s1205_s17   ;;  %s897_s16 = sphi %s956_s16, %s1204_s16   ;;  %s893_s15 = sphi %s954_s15, %s1203_s15  }
   0x7   : > { %p93_p0 = scmp.ne.s32.totalorder %s897_s16, %s893_s15  ;;  %p1185_p1 = scmp.eq.s32.totalorder %s975_s19, 0 }
   0x8   : > { %p144_p3 = scmp.eq.s32.totalorder %s673_s20, 1  ;;  %p674_p5 = scmp.ge.s32.totalorder %s905_s18, 1 }
   0x9   : > { %p984_p4 = por %p1185_p1, %p93_p0  ;;  %p151_p7 = scmp.lt.s32.totalorder %s905_s18, 3 }
   0xa   : > { %p989_p6 = por %p144_p3, %p93_p0  ;;  %s907_s24 = smov [#allocation5]  }
   0xb   : > { %s1189_s21 = scalar_select %p984_p4, 1, 0 }
   0xc   : > { %s1190_s22 = scalar_select %p989_p6, 1, 0 }
   0xd   : > { %p994_p8 = pnand %p674_p5, %p151_p7  ;;  %s163_s25 = sshll.u32 %s907_s24, 4  ;;  %s164_s25 = int_to_ptr.vmem [resolvable:$true] %s163_s25 }
   0xe   : > { %s1008_s27 = sadd.s32 1, %s905_s18   ;;  %s80_s28 = sadd.s32 1, %s901_s17 }
   0xf   : > { %s1191_s23 = scalar_select %p994_p8, 1, 0 }
  0x10   : > { %p706_p9 = pneg %p994_p8  ;;  %s77_s29 = ssub.s32 %s905_s18, %s1008_s27 }
  0x11   : > { %s794_s30 = scalar_lea.vmem %s164_s25, 512  ;;  %p802_p5 = scmp.lt.s32.totalorder %s164_s25, %s164_s25 }
  0x12   : > { %p1003_p11 = pnand %p706_p9, %p1185_p1  ;;  %p795_p13 = scmp.ne.s32.totalorder %s164_s25, %s794_s30 }
  0x13   : > { %p803_p7 = scmp.lt.s32.totalorder %s794_s30, %s794_s30 }
  0x14   : > { %p785_p12 = pneg %p1003_p11 }
  0x15   : > { %p804_p10 = por %p803_p7, %p802_p5 }
  0x16   : > { %p797_p0 = pnand %p795_p13, %p785_p12 }
  0x18   : > { %p798_p3 = pneg %p797_p0 }
  0x1a   : > { %p805_p2 = pnand %p804_p10, %p798_p3 }
  0x1c   : > { %808 = shalt.err (!%p805_p2)
}
  0x1d   : > { %s908_s5 = smov 256   ;;  %s909_s6 = smov 16  }
  0x1e   : > { %709 = dma.hbm_to_vmem [thread:$0]  (!%p1003_p11), %s1183_s3, 512, %s164_s25, [#allocation6], %s908_s5, %s908_s5, %s909_s6  }
  0x1f   : > { %p78_p9 = scmp.eq.s32.totalorder %s77_s29, 0  ;;  %p87_p12 = scmp.ne.s32.totalorder %s901_s17, %s897_s16 }
  0x20   : > { %p88_p10 = scmp.eq.s32.totalorder %s905_s18, 0  ;;  %p719_p2 = scmp.lt.s32.totalorder %s905_s18, 2 }
  0x21   : > { %s1025_s9 = scalar_select %p78_p9, %s901_s17, %s80_s28  }
  0x22   : > { %p89_p13 = por %p88_p10, %p87_p12  ;;  %p1193_p0 = scmp.eq.s32.totalorder %s975_s19, 1 }
  0x23   : > { %s192_s11 = sand.u32 1, %s901_s17   ;;  %s678_s12 = sshll.u32 %s905_s18, 6 }
  0x24   : > { %p1029_p3 = por %p1193_p0, %p87_p12  ;;  %s677_s13 = sshll.u32 %s192_s11, 2 }
  0x25   : > { %s1038_s24 = scalar_lea.hbm %s1182_s2, %s678_s12  ;;  %s196_s25 = scalar_lea.vmem [#allocation2], %s677_s13 }
  0x26   : > { %s1194_s10 = scalar_select %p1029_p3, 1, 0 }
  0x27   : > { %s203_s26 = sshll.u32 %s196_s25, 4  ;;  %p1040_p11 = pnand %p719_p2, %p89_p13  ;;  %s204_s26 = int_to_ptr.vmem [resolvable:$true] %s203_s26 }
  0x28   : > { %s193_s29 = scalar_lea.sflag [#allocation3], %s192_s11  ;;  %s809_s30 = scalar_lea.hbm %s1038_s24, 64 }
  0x29   : > { %p810_p5 = scmp.ne.s32.totalorder %s1038_s24, %s809_s30  ;;  %p811_p7 = pneg %p1040_p11 }
  0x2a   : > { %s814_s7 = scalar_lea.hbm %s1182_s2, 128  ;;  %p815_p10 = scmp.lt.s32.totalorder %s1038_s24, %s1182_s2 }
  0x2b   : > { %p812_p9 = pnand %p811_p7, %p810_p5  ;;  %p816_p2 = scmp.lt.s32.totalorder %s814_s7, %s809_s30 }
  0x2d   : > { %p813_p12 = pneg %p812_p9  ;;  %p817_p13 = por %p816_p2, %p815_p10 }
  0x2f   : > { %p818_p0 = pnand %p817_p13, %p813_p12 }
  0x31   : > { %821 = shalt.err (!%p818_p0)
}
  0x32   : > { %s822_s13 = scalar_lea.vmem %s204_s26, 64  ;;  %s910_s11 = smov [#allocation2]  }
  0x33   : > { %p823_p1 = scmp.ne.s32.totalorder %s204_s26, %s822_s13  ;;  %s827_s14 = sshll.u32 %s910_s11, 4  ;;  %s828_s14 = int_to_ptr.vmem [resolvable:$false] %s827_s14 }
  0x34   : > { %s829_s20 = scalar_lea.vmem %s828_s14, 128  ;;  %p830_p5 = scmp.lt.s32.totalorder %s204_s26, %s828_s14 }
  0x35   : > { %p825_p6 = pnand %p823_p1, %p811_p7  ;;  %p831_p9 = scmp.lt.s32.totalorder %s829_s20, %s822_s13 }
  0x37   : > { %p826_p3 = pneg %p825_p6  ;;  %p832_p4 = por %p831_p9, %p830_p5 }
  0x39   : > { %p833_p8 = pnand %p832_p4, %p826_p3 }
  0x3b   : > { %836 = shalt.err (!%p833_p8)
}
  0x3c   : > { %713 = dma.hbm_to_vmem [thread:$0]  (!%p1040_p11), %s1038_s24, 64, %s204_s26, %s193_s29  }
  0x3d   : > { %p1196_p12 = scmp.ne.s32.totalorder %s1191_s23, 0 }
  0x3e   : > { %s1061_s25 = sand.u32 (!%p1196_p12), 1, %s897_s16   ;;  %p1197_p1 = scmp.ne.s32.totalorder (!%p1196_p12), %s1189_s21, 0 }
  0x3f   : > { %212 = sbr.rel (%p1196_p12) target bundleno = 474 (0x1da), region = 36  ;;  %s680_s30 = sshll.u32 (!%p1196_p12), %s1061_s25, 2 }
  0x40   : > { %s215_s5 = scalar_lea.sflag (!%p1196_p12), [#allocation3], %s1061_s25  ;;  %s218_s6 = scalar_lea.vmem (!%p1196_p12), [#allocation2], %s680_s30 }
  0x44   : > { %880 = dma.done.wait (%p1197_p1), %s215_s5, 64  }
  0x45   : > { %882 = vsyncadd (%p1197_p1), %s215_s5, 4294967232  ;;  %p1198_p4 = scmp.eq.s32.totalorder %s975_s19, 0 }
  0x47   : > { %884 = dma.done.wait (%p1198_p4), [#allocation6], 512   ;;  %p1199_p6 = pmov %p1198_p4 }
  0x48   : > { %p256_p8 = scmp.lt.s32.totalorder %s975_s19, 1  ;;  %v911_v0 = vmov 0   ;;  %v912_v1 = vmov 1   ;;  %vm281_vm0 = vcmask 1041408   ;;  %v337_v5 = vld [vmem:[%s218_s6] sm:$0xf]  ;;  %v354_v36 = vlaneseq }
  0x49   : > { %886 = vsyncadd (%p1199_p6), [#allocation6], 4294966784  ;;  %320 = vmatprep.mubr.bf16.mxu0 %v911_v0  ;;  %774 = vset.pattern.permute.xlu0 %v911_v0  ;;  %v338_v6 = vunpack.c.l.bf16 %v337_v5  ;;  %vm277_vm1 = vcmask 31744   ;;  %v913_v8 = vmov 4   ;;  %v914_v9 = vmov 2   ;;  %s920_s12 = smov 111  }
  0x4a   : > { %s257_s23 = scalar_select %p256_p8, %s975_s19, 1  ;;  %776 = vset.pattern.permute.xlu1 %v912_v1  ;;  %v915_v10 = vmov 3   ;;  %v916_v11 = vmov 5   ;;  %v917_v12 = vmov 6   ;;  %v918_v13 = vmov 7   ;;  %v1093_v44 = vld [vmem:[#allocation5] sm:$0xff] }
  0x4b   : > { %360 = vperm.xlu0 %774, %v338_v6   ;;  %385 = vperm.xlu1 %776, %v338_v6   ;;  %v919_v14 = vmov 8   ;;  %s921_s13 = smov 17   ;;  %s922_s11 = smov 16   ;;  %v1085_v38 = vand.u32 127, %v354_v36  ;;  %v1087_v39 = vshrl.u32 %v354_v36, 7  ;;  %v1097_v46 = vld [vmem:[#allocation5 + $0x8] sm:$0xff] }
  0x4c   : > { %s696_s24 = sshll.u32 %s257_s23, 2  ;;  %s923_s14 = smov 15  }
  0x4d   : > { %s260_s21 = scalar_lea.vmem %s1180_s0, %s696_s24  ;;  %s264_s8 = scalar_lea.vmem %s1181_s1, %s696_s24  ;;  %vm356_vm4 = vcmp.lt.s32.totalorder %v1085_v38, 17  ;;  %v367_v42 = vsub.s32 0, %v1087_v39  ;;  %vm381_vm5 = vcmp.lt.s32.totalorder %v1085_v38, 16  ;;  %v392_v45 = vsub.s32 1, %v1087_v39 }
  0x4e   : > { %v686_v2 = vld.sshfl [vmem:[%s260_s21] sm:$0x33 pattern:$0x76325410]  ;;  %s924_s20 = smov 1   ;;  %s925_s30 = smov 127  }
  0x4f   : > { %v276_v3 = vcombine.high %v686_v2, %v686_v2  ;;  %v283_v4 = vsel %vm281_vm0, %v686_v2, 0  ;;  %v267_v7 = vld [vmem:[%s264_s8] sm:$0xf]  ;;  %775 = vset.pattern.permute.xlu0 %v913_v8  ;;  %s926_s5 = smov 113   ;;  %s927_s6 = smov 112   ;;  %v368_v50 = vrot.slane %v1093_v44, %v367_v42  ;;  %vm406_vm6 = vcmp.lt.s32.totalorder %v1085_v38, 15 }
  0x50   : > { %345 = vperm.xlu0 %775, %v338_v6   ;;  %v417_v54 = vsub.s32 2, %v1087_v39  ;;  %v372_v56 = vrot.slane %v1097_v46, %v367_v42  ;;  %v393_v59 = vrot.slane %v1093_v44, %v392_v45  ;;  %v397_v60 = vrot.slane %v1097_v46, %v392_v45  ;;  %s682_s23 = sshll.u32 %s1061_s25, 4  ;;  %s697_s24 = sshll.u32 %s975_s19, 8 }
  0x51   : > { %687 = vmatprep.subr.msk.bf16.mxu0 %vm281_vm0, %v276_v3  ;;  %vm431_vm7 = vcmp.lt.s32.totalorder %v1085_v38, 1  ;;  %v442_v61 = vsub.s32 3, %v1087_v39  ;;  %v467_v62 = vsub.s32 5, %v1087_v39  ;;  %vm456_vm8 = vcmp.lt.s32.totalorder %v1085_v38, 127  ;;  %s255_s26 = scalar_lea.vmem [#allocation7], %s682_s23  ;;  %s1143_s7 = scalar_lea.hbm %s1184_s4, %s697_s24 }
  0x52   : > { %303 = vmatpush1.bf16.msra.mxu0 %v283_v4  ;;  %v418_v5 = vrot.slane %v1093_v44, %v417_v54  ;;  %vm481_vm9 = vcmp.lt.s32.totalorder %v1085_v38, 113  ;;  %vm506_vm10 = vcmp.lt.s32.totalorder %v1085_v38, 112  ;;  %vm531_vm11 = vcmp.lt.s32.totalorder %v1085_v38, 111  ;;  %s569_s28 = sshll.u32 %s255_s26, 4  ;;  %s555_s8 = scalar_lea.sflag [#allocation4], %s1061_s25  ;;  %s570_s28 = int_to_ptr.vmem [resolvable:$true] %s569_s28 }
  0x53   : > { %p1200_p11 = scmp.ne.s32.totalorder %s1194_s10, 0  ;;  %s928_s19 = smov [#allocation7]  }
  0x54   : > { %777 = vset.pattern.permute.xlu0 %v914_v9 }
  0x55   : > { %688 = vmatmul.mubr.msk.bf16.vlgmr.msra.gmra.mxu0 %vm277_vm1, %v267_v7  ;;  %410 = vperm.xlu0 %777, %v338_v6  }
  0x59   : > { %778 = vset.pattern.permute.xlu0 %v915_v10 }
  0x5a   : > { %435 = vperm.xlu0 %778, %v338_v6  }
  0x5e   : > { %779 = vset.pattern.permute.xlu0 %v916_v11 }
  0x5f   : > { %460 = vperm.xlu0 %779, %v338_v6  }
  0x63   : > { %780 = vset.pattern.permute.xlu0 %v917_v12 }
  0x64   : > { %485 = vperm.xlu0 %780, %v338_v6  }
  0x68   : > { %781 = vset.pattern.permute.xlu0 %v918_v13  ;;  %v443_v13 = vrot.slane %v1093_v44, %v442_v61 }
  0x69   : > { %510 = vperm.xlu0 %781, %v338_v6  }
  0x6d   : > { %782 = vset.pattern.permute.xlu0 %v919_v14  ;;  %v492_v14 = vsub.s32 6, %v1087_v39 }
  0x6e   : > { %535 = vperm.xlu0 %782, %v338_v6   ;;  %v422_v6 = vrot.slane %v1097_v46, %v417_v54 }
  0xc6   : > { %v386_v25 = vpop.permute.xlu1 %385  ;;  %v361_v29 = vpop.permute.xlu0 %360 }
  0xcb   : > { %v346_v31 = vpop.permute.xlu0 %345 }
  0xd0   : > { %v411_v33 = vpop.permute.xlu0 %410 }
  0xd5   : > { %v436_v37 = vpop.permute.xlu0 %435 }
  0xda   : > { %v1089_v41 = vpop.permute.xlu0 %460 }
  0xdf   : > { %v486_v55 = vpop.permute.xlu0 %485 }
 0x115   : > { %v322_v15 = vpop.f32.mrf.mxu0 }
 0x116   : > { %vm329_vm2 = vcmp.ge.f32.partialorder %v322_v15, 0.0  ;;  %v331_v16 = vmul.f32 0.2, %v322_v15 }
 0x117   : > { %v324_v17 = vpop.f32.mrf.mxu0 }
 0x118   : > { %v333_v18 = vsel %vm329_vm2, %v322_v15, %v331_v16  ;;  %v332_v22 = vmul.f32 0.2, %v324_v17  ;;  %vm330_vm3 = vcmp.ge.f32.partialorder %v324_v17, 0.0  ;;  %v511_v15 = vpop.permute.xlu0 %510 }
 0x119   : > { %v335_v19 = vmul.f32 1.4142135, %v333_v18  ;;  %v326_v20 = vpop.f32.mrf.mxu0  ;;  %v447_v18 = vrot.slane %v1097_v46, %v442_v61 }
 0x11a   : > { %v334_v23 = vsel %vm330_vm3, %v324_v17, %v332_v22 }
 0x11b   : > { %527 = vrot.lane.b32.xlu0 %v335_v19, %s920_s12  ;;  %350 = vrot.lane.b32.xlu1 %v335_v19, %s921_s13  ;;  %v327_v21 = vpop.f32.mrf.mxu0  ;;  %v336_v24 = vmul.f32 1.4142135, %v334_v23  ;;  %v348_v49 = vmul.f32 %v346_v31, %v335_v19 }
 0x11d   : > { %v349_v4 = vmul.f32 %v346_v31, %v336_v24  ;;  %v517_v31 = vsub.s32 7, %v1087_v39 }
 0x11f   : > { %377 = vrot.lane.b32.xlu1 %v335_v19, %s922_s11 }
 0x123   : > { %402 = vrot.lane.b32.xlu1 %v335_v19, %s923_s14 }
 0x127   : > { %427 = vrot.lane.b32.xlu1 %v335_v19, %s924_s20 }
 0x12b   : > { %452 = vrot.lane.b32.xlu1 %v335_v19, %s925_s30 }
 0x12f   : > { %477 = vrot.lane.b32.xlu1 %v335_v19, %s926_s5 }
 0x133   : > { %502 = vrot.lane.b32.xlu1 %v335_v19, %s927_s6  ;;  %v468_v19 = vrot.slane %v1093_v44, %v467_v62 }
 0x137   : > { %352 = vrot.lane.b32.xlu1 %v336_v24, %s921_s13  ;;  %s841_s13 = sshll.u32 %s928_s19, 4  ;;  %s842_s13 = int_to_ptr.vmem [resolvable:$false] %s841_s13 }
 0x138   : > { %p844_p2 = scmp.lt.s32.totalorder %s570_s28, %s842_s13 }
 0x13b   : > { %379 = vrot.lane.b32.xlu1 %v336_v24, %s922_s11  ;;  %s843_s11 = scalar_lea.vmem %s842_s13, 512 }
 0x13f   : > { %404 = vrot.lane.b32.xlu1 %v336_v24, %s923_s14 }
 0x143   : > { %429 = vrot.lane.b32.xlu1 %v336_v24, %s924_s20 }
 0x147   : > { %454 = vrot.lane.b32.xlu1 %v336_v24, %s925_s30 }
 0x14b   : > { %479 = vrot.lane.b32.xlu1 %v336_v24, %s926_s5 }
 0x14f   : > { %504 = vrot.lane.b32.xlu1 %v336_v24, %s927_s6 }
 0x153   : > { %529 = vrot.lane.b32.xlu1 %v336_v24, %s920_s12  ;;  %s837_s12 = scalar_lea.vmem %s570_s28, 256 }
 0x154   : > { %p838_p3 = scmp.ne.s32.totalorder %s570_s28, %s837_s12  ;;  %p845_p13 = scmp.lt.s32.totalorder %s843_s11, %s837_s12 }
 0x156   : > { %p839_p7 = pnand %p838_p3, %p1200_p11  ;;  %p846_p0 = por %p845_p13, %p844_p2 }
 0x158   : > { %p840_p10 = pneg %p839_p7 }
 0x15a   : > { %p847_p5 = pnand %p846_p0, %p840_p10 }
 0x18d   : > { %v351_v26 = vpop.permute.xlu1 %350 }
 0x191   : > { %v378_v27 = vpop.permute.xlu1 %377 }
 0x195   : > { %v403_v28 = vpop.permute.xlu1 %402 }
 0x199   : > { %v428_v30 = vpop.permute.xlu1 %427 }
 0x19d   : > { %v453_v32 = vpop.permute.xlu1 %452 }
 0x1a1   : > { %v1081_v34 = vpop.permute.xlu1 %477 }
 0x1a5   : > { %v1083_v35 = vpop.permute.xlu1 %502 }
 0x1a9   : > { %v353_v40 = vpop.permute.xlu1 %352 }
 0x1aa   : > { %v357_v47 = vsel %vm356_vm4, %v351_v26, %v353_v40  ;;  %v358_v48 = vsel %vm356_vm4, %v353_v40, %v351_v26 }
 0x1ab   : > { %v363_v57 = vmul.f32 %v361_v29, %v358_v48  ;;  %v364_v58 = vmul.f32 %v361_v29, %v357_v47  ;;  %v536_v48 = vpop.permute.xlu0 %535 }
 0x1ad   : > { %v380_v43 = vpop.permute.xlu1 %379  ;;  %v373_v7 = vmul.f32 %v368_v50, %v363_v57  ;;  %v374_v8 = vmul.f32 %v372_v56, %v364_v58  ;;  %v522_v56 = vrot.slane %v1097_v46, %v517_v31 }
 0x1ae   : > { %v382_v52 = vsel %vm381_vm5, %v378_v27, %v380_v43  ;;  %v383_v53 = vsel %vm381_vm5, %v380_v43, %v378_v27  ;;  %v472_v27 = vrot.slane %v1097_v46, %v467_v62 }
 0x1af   : > { %v388_v63 = vmul.f32 %v386_v25, %v383_v53  ;;  %v389_v0 = vmul.f32 %v386_v25, %v382_v52  ;;  %v375_v25 = vadd.f32 %v373_v7, %v348_v49  ;;  %v376_v26 = vadd.f32 %v374_v8, %v349_v4  ;;  %v689_v4 = vld [vmem:[#allocation5 + $0x10] ss:$0 sm:$0xff] }
 0x1b0   : > { %v497_v49 = vrot.slane %v1097_v46, %v492_v14  ;;  %v518_v53 = vrot.slane %v1093_v44, %v517_v31 }
 0x1b1   : > { %v405_v51 = vpop.permute.xlu1 %404  ;;  %v398_v16 = vmul.f32 %v393_v59, %v388_v63  ;;  %v399_v17 = vmul.f32 %v397_v60, %v389_v0 }
 0x1b2   : > { %v407_v1 = vsel %vm406_vm6, %v403_v28, %v405_v51  ;;  %v408_v2 = vsel %vm406_vm6, %v405_v51, %v403_v28 }
 0x1b3   : > { %v413_v11 = vmul.f32 %v411_v33, %v408_v2  ;;  %v414_v12 = vmul.f32 %v411_v33, %v407_v1  ;;  %v400_v33 = vadd.f32 %v398_v16, %v375_v25  ;;  %v401_v36 = vadd.f32 %v399_v17, %v376_v26 }
 0x1b5   : > { %v430_v3 = vpop.permute.xlu1 %429  ;;  %v423_v28 = vmul.f32 %v418_v5, %v413_v11  ;;  %v424_v29 = vmul.f32 %v422_v6, %v414_v12  ;;  %v690_v5 = vld [vmem:[#allocation5 + $0x18] ss:$0 sm:$0xff] }
 0x1b6   : > { %v432_v9 = vsel %vm431_vm7, %v428_v30, %v430_v3  ;;  %v433_v10 = vsel %vm431_vm7, %v430_v3, %v428_v30  ;;  %v493_v30 = vrot.slane %v1093_v44, %v492_v14  ;;  %v528_v44 = vpop.permute.xlu0 %527 }
 0x1b7   : > { %v438_v21 = vmul.f32 %v436_v37, %v433_v10  ;;  %v439_v22 = vmul.f32 %v436_v37, %v432_v9  ;;  %v425_v39 = vadd.f32 %v423_v28, %v400_v33  ;;  %v426_v52 = vadd.f32 %v424_v29, %v401_v36 }
 0x1b9   : > { %v455_v20 = vpop.permute.xlu1 %454  ;;  %v449_v43 = vmul.f32 %v447_v18, %v439_v22 }
 0x1ba   : > { %v457_v23 = vsel %vm456_vm8, %v453_v32, %v455_v20  ;;  %v458_v24 = vsel %vm456_vm8, %v455_v20, %v453_v32  ;;  %v448_v32 = vmul.f32 %v443_v13, %v438_v21 }
 0x1bb   : > { %v463_v37 = vmul.f32 %v1089_v41, %v457_v23  ;;  %v464_v40 = vmul.f32 %v1089_v41, %v458_v24  ;;  %v451_v58 = vadd.f32 %v449_v43, %v426_v52 }
 0x1bd   : > { %v480_v42 = vpop.permute.xlu1 %479  ;;  %v473_v41 = vmul.f32 %v468_v19, %v463_v37  ;;  %v474_v54 = vmul.f32 %v472_v27, %v464_v40 }
 0x1be   : > { %v482_v45 = vsel %vm481_vm9, %v1081_v34, %v480_v42  ;;  %v483_v47 = vsel %vm481_vm9, %v480_v42, %v1081_v34  ;;  %v450_v34 = vadd.f32 %v448_v32, %v425_v39 }
 0x1bf   : > { %v488_v50 = vmul.f32 %v486_v55, %v482_v45  ;;  %v489_v51 = vmul.f32 %v486_v55, %v483_v47  ;;  %v476_v1 = vadd.f32 %v474_v54, %v451_v58 }
 0x1c0   : > { %v475_v0 = vadd.f32 %v473_v41, %v450_v34 }
 0x1c1   : > { %v505_v57 = vpop.permute.xlu1 %504  ;;  %v498_v55 = vmul.f32 %v493_v30, %v488_v50  ;;  %v499_v61 = vmul.f32 %v497_v49, %v489_v51 }
 0x1c2   : > { %v507_v59 = vsel %vm506_vm10, %v1083_v35, %v505_v57  ;;  %v508_v60 = vsel %vm506_vm10, %v505_v57, %v1083_v35 }
 0x1c3   : > { %v513_v62 = vmul.f32 %v511_v15, %v507_v59  ;;  %v514_v63 = vmul.f32 %v511_v15, %v508_v60  ;;  %v500_v7 = vadd.f32 %v498_v55, %v475_v0  ;;  %v501_v8 = vadd.f32 %v499_v61, %v476_v1 }
 0x1c5   : > { %v523_v2 = vmul.f32 %v518_v53, %v513_v62  ;;  %v524_v46 = vmul.f32 %v522_v56, %v514_v63  ;;  %v530_v3 = vpop.permute.xlu1 %529 }
 0x1c6   : > { %v532_v6 = vsel %vm531_vm11, %v528_v44, %v530_v3  ;;  %v533_v35 = vsel %vm531_vm11, %v530_v3, %v528_v44 }
 0x1c7   : > { %v538_v9 = vmul.f32 %v536_v48, %v532_v6  ;;  %v539_v10 = vmul.f32 %v536_v48, %v533_v35  ;;  %v525_v11 = vadd.f32 %v523_v2, %v500_v7  ;;  %v526_v12 = vadd.f32 %v524_v46, %v501_v8 }
 0x1c9   : > { %v548_v13 = vmul.f32 %v689_v4, %v538_v9  ;;  %v549_v14 = vmul.f32 %v690_v5, %v539_v10 }
 0x1cb   : > { %v550_v15 = vadd.f32 %v548_v13, %v525_v11  ;;  %v551_v16 = vadd.f32 %v549_v14, %v526_v12 }
 0x1cd   : > { %552 = vst [vmem:[%s255_s26] sm:$0xff] %v550_v15  ;;  %553 = vst [vmem:[%s255_s26 + $0x8] sm:$0xff] %v551_v16 }
 0x1ce   : > { %850 = shalt.err (!%p847_p5)
}
 0x1cf   : > { %s851_s14 = scalar_lea.hbm %s1143_s7, 256  ;;  %s855_s30 = scalar_lea.hbm %s1184_s4, 512 }
 0x1d0   : > { %p852_p9 = scmp.ne.s32.totalorder %s1143_s7, %s851_s14  ;;  %p856_p4 = scmp.lt.s32.totalorder %s1143_s7, %s1184_s4 }
 0x1d1   : > { %p857_p6 = scmp.lt.s32.totalorder %s855_s30, %s851_s14 }
 0x1d2   : > { %p853_p12 = pnand %p852_p9, %p1200_p11 }
 0x1d3   : > { %p858_p8 = por %p857_p6, %p856_p4 }
 0x1d4   : > { %p854_p1 = pneg %p853_p12 }
 0x1d6   : > { %p859_p3 = pnand %p858_p8, %p854_p1 }
 0x1d8   : > { %862 = shalt.err (!%p859_p3)
}
 0x1d9   : > { %704 = dma.vmem_to_hbm [thread:$0]  (%p1200_p11), %s570_s28, 256, %s1143_s7, %s555_s8  }
 0x1da PF: > { %s581_s23 = sand.u32 1, %s893_s15   ;;  %p1201_p7 = scmp.ne.s32.totalorder %s1190_s22, 0 }
 0x1db   : > { %p1202_p10 = scmp.ge.s32.totalorder %s905_s18, 2  ;;  %s582_s24 = scalar_lea.sflag [#allocation4], %s581_s23 }
 0x1dd   : > { %p715_p2 = pnand %p1202_p10, %p1201_p7 }
 0x1df   : > { %p716_p13 = pneg %p715_p2 }
 0x1e1   : > { %888 = dma.done.wait (%p716_p13), %s582_s24, 256  }
 0x1e2   : > { %890 = vsyncadd (%p716_p13), %s582_s24, 4294967040  ;;  %p18_p0 = scmp.ge.s32.totalorder %s1008_s27, 4   ;;  %s1203_s15 = smov %s897_s16 }
 0x1e3   : > { %s1204_s16 = smov %s901_s17  ;;  %s1205_s17 = smov %s1025_s9 }
 0x1e4   : > { %s1206_s18 = smov %s1008_s27  ;;  %20 = sbr.rel (!%p18_p0) target bundleno = 6 (0x6), region = 91 }
 0x1e9   :  { %587 = vsyncpa [#allocation3], 1 }
 0x1ea   :  { %589 = vsyncpa [#allocation3 + $0x1], 1 }
 0x1eb   :  { %590 = vsyncpa [#allocation6], 1 }
 0x1ec   :  { %591 = vsyncpa [#allocation4], 1 }
 0x1ed   :  { %593 = vsyncpa [#allocation4 + $0x1], 1 }

</bundles_post_ra>
